<compile_context>
chip_gen: v7x
topology: tpu7x:2x2x1
jax: 0.10.0
libtpu: 0.0.40
codegen_flags: <defaults>
</compile_context>

<pallas_src>
from typing import NamedTuple

import jax
import jax.numpy as jnp
from jax.experimental import pallas as pl
from jax.experimental.pallas import tpu as pltpu


LANE = 128
SUBLANE_BF16 = 16
_DEFAULT_VMEM_BUDGET = 48 * 1024 * 1024   # conservative: fits v7x's 64 MiB/TC
_TINY_XLA_THRESHOLD = 64 * 1024           # B * d_in below this -> plain XLA


def _round_up(x, m):
    return ((x + m - 1) // m) * m


def _vmem_budget_bytes():
    """~85% of per-core VMEM when queryable, else a v7x-safe default."""
    try:
        cap = int(pltpu.get_tpu_info().vmem_capacity_bytes)
        return max(32 * 1024 * 1024, min(int(0.85 * cap), 108 * 1024 * 1024))
    except Exception:
        return _DEFAULT_VMEM_BUDGET


class MLP2Params(NamedTuple):
    w1: jax.Array   # [d_in_p,  hid_p ]  compute dtype (bf16)
    b1: jax.Array   # [1,       hid_p ]  f32
    w2: jax.Array   # [hid_p,   d_out_p] compute dtype (bf16)
    b2: jax.Array   # [1,       d_out_p] f32
    d_in: int
    hidden: int
    d_out: int


def prepare_mlp2_params(w1, b1, w2, b2, compute_dtype=jnp.bfloat16):
    """One-time pad (to multiples of 128) + cast of the MLP2 parameters.

    w1: [d_in, hidden]  (= PyTorch layer1.weight.T)
    b1: [hidden] or [1, hidden]
    w2: [hidden, d_out] (= PyTorch layer2.weight.T)
    b2: [d_out] or [1, d_out]

    Zero padding is mathematically inert: padded x columns hit zero W1 rows,
    padded hidden columns have zero bias (ReLU(0)=0) and zero W2 rows, and
    padded output columns are sliced off by the wrapper.
    """
    d_in, hidden = w1.shape
    hidden2, d_out = w2.shape
    assert hidden == hidden2, (w1.shape, w2.shape)
    d_in_p = _round_up(d_in, LANE)
    hid_p = _round_up(hidden, LANE)
    d_out_p = _round_up(d_out, LANE)

    w1_p = jnp.pad(jnp.asarray(w1), ((0, d_in_p - d_in), (0, hid_p - hidden))
                   ).astype(compute_dtype)
    w2_p = jnp.pad(jnp.asarray(w2), ((0, hid_p - hidden), (0, d_out_p - d_out))
                   ).astype(compute_dtype)
    b1_p = jnp.pad(jnp.asarray(b1, jnp.float32).reshape(1, hidden),
                   ((0, 0), (0, hid_p - hidden)))
    b2_p = jnp.pad(jnp.asarray(b2, jnp.float32).reshape(1, d_out),
                   ((0, 0), (0, d_out_p - d_out)))
    return MLP2Params(w1_p, b1_p, w2_p, b2_p, d_in, hidden, d_out)


# ---------------------------------------------------------------------------
# Kernels
# ---------------------------------------------------------------------------

def _mlp2_resident_kernel(x_ref, w1_ref, b1_ref, w2_ref, b2_ref, o_ref):
    # layer1 on the MXU (bf16 x bf16 -> f32 accumulation).
    h = jnp.dot(x_ref[...], w1_ref[...], preferred_element_type=jnp.float32)
    # bias add + ReLU in f32 on the VPU.
    h = jnp.maximum(h + b1_ref[...], 0.0)
    # layer2 on the MXU; one extra bf16 rounding of h (documented above).
    out = jnp.dot(h.astype(w2_ref.dtype), w2_ref[...],
                  preferred_element_type=jnp.float32)
    o_ref[...] = (out + b2_ref[...]).astype(o_ref.dtype)


def _mlp2_tiled_kernel(x_ref, w1_ref, b1_ref, w2_ref, b2_ref, o_ref, acc_ref):
    # grid = (batch tiles, d_out tiles, hidden tiles). hidden is the output
    # axis of layer1 and the reduction axis of layer2; since ReLU is
    # elementwise, the hidden dim can be chunked and accumulated.
    k = pl.program_id(2)

    @pl.when(k == 0)
    def _():
        acc_ref[...] = jnp.zeros_like(acc_ref)

    h = jnp.dot(x_ref[...], w1_ref[...], preferred_element_type=jnp.float32)
    h = jnp.maximum(h + b1_ref[...], 0.0)
    acc_ref[...] += jnp.dot(h.astype(w2_ref.dtype), w2_ref[...],
                            preferred_element_type=jnp.float32)

    @pl.when(k == pl.num_programs(2) - 1)
    def _():
        o_ref[...] = (acc_ref[...] + b2_ref[...]).astype(o_ref.dtype)


# ---------------------------------------------------------------------------
# pallas_call wrappers
# ---------------------------------------------------------------------------

def _resident_spec(shape, index_map):
    # Constant-index operand: request a single VMEM buffer (default double
    # buffering is wasted on it). The VMEM budget below still assumes 2
    # buffers in case this request is silently ignored by this JAX version.
    try:
        return pl.BlockSpec(shape, index_map, pipeline_mode=pl.Buffered(1))
    except Exception:
        return pl.BlockSpec(shape, index_map)


def _resident_footprint(block_b, d_in_p, hid_p, d_out_p, out_itemsize):
    weights = 2 * ((d_in_p * hid_p + hid_p * d_out_p) * 2
                   + (hid_p + d_out_p) * 4)                       # assume 2 bufs
    stream = 2 * block_b * (d_in_p * 2 + d_out_p * out_itemsize)  # x / out tiles
    hidden = block_b * hid_p * 4                                  # f32 temp
    return weights + stream + hidden


def _tiled_footprint(block_b, d_in_p, block_h, block_n, out_itemsize):
    return (2 * block_b * d_in_p * 2
            + 2 * d_in_p * block_h * 2
            + 2 * block_h * 4
            + 2 * block_h * block_n * 2
            + 2 * block_n * 4
            + 2 * block_b * block_n * out_itemsize
            + block_b * block_n * 4          # f32 accumulator scratch
            + block_b * block_h * 4)         # f32 hidden temp


def _pick_block_b(B, d_in_p, hid_p, d_out_p, out_itemsize, budget):
    b_aligned = _round_up(max(B, 1), SUBLANE_BF16)
    # Prefer 512/256 rows to fill the 256-wide MXU (v6e/v7x) and amortize the
    # ~0.35us/grid-step overhead; never pad past the 16-aligned batch, and
    # shrink until the streamed tiles fit comfortably inside the VMEM budget.
    # TODO(synk): on v7x, also bias block_b toward >=2 grid steps so both
    # TensorCores are used (needs a reliable core-count query).
    for cand in (512, 256, 128, 64, 32, 16):
        bb = min(cand, b_aligned)
        stream = 2 * bb * (d_in_p * 2 + d_out_p * out_itemsize) + bb * hid_p * 4
        if stream <= max(budget // 2, budget - 8 * 1024 * 1024):
            return bb
    return SUBLANE_BF16


def _mlp2_resident(x_p, p, block_b, out_dtype, vmem_budget):
    b_p, d_in_p = x_p.shape
    hid_p = p.w1.shape[1]
    d_out_p = p.w2.shape[1]
    out_itemsize = jnp.dtype(out_dtype).itemsize
    grid = (b_p // block_b,)

    footprint = _resident_footprint(block_b, d_in_p, hid_p, d_out_p, out_itemsize)
    vmem_limit = min(vmem_budget, max(32 * 1024 * 1024, int(1.25 * footprint)))

    cost = pl.CostEstimate(
        flops=2 * b_p * d_in_p * hid_p + 2 * b_p * hid_p * d_out_p,
        transcendentals=0,
        bytes_accessed=(x_p.size * 2 + p.w1.size * 2 + p.w2.size * 2
                        + p.b1.size * 4 + p.b2.size * 4
                        + b_p * d_out_p * out_itemsize),
    )

    return pl.pallas_call(
        _mlp2_resident_kernel,
        out_shape=jax.ShapeDtypeStruct((b_p, d_out_p), out_dtype),
        grid_spec=pltpu.PrefetchScalarGridSpec(
            num_scalar_prefetch=0,
            grid=grid,
            in_specs=[
                pl.BlockSpec((block_b, d_in_p), lambda i: (i, 0)),   # x (streamed)
                _resident_spec((d_in_p, hid_p), lambda i: (0, 0)),   # W1 (resident)
                _resident_spec((1, hid_p), lambda i: (0, 0)),        # b1 (resident)
                _resident_spec((hid_p, d_out_p), lambda i: (0, 0)),  # W2 (resident)
                _resident_spec((1, d_out_p), lambda i: (0, 0)),      # b2 (resident)
            ],
            out_specs=pl.BlockSpec((block_b, d_out_p), lambda i: (i, 0)),
        ),
        compiler_params=pltpu.CompilerParams(
            dimension_semantics=("parallel",),
            vmem_limit_bytes=vmem_limit,
        ),
        cost_estimate=cost,
    )(x_p, p.w1, p.b1, p.w2, p.b2)


def _mlp2_tiled(x_p, p, block_b, out_dtype, vmem_budget):
    b_p, d_in_p = x_p.shape
    hid_p = p.w1.shape[1]
    d_out_p = p.w2.shape[1]
    out_itemsize = jnp.dtype(out_dtype).itemsize

    # Largest (hidden, d_out) tile pair that divides the padded dims and fits
    # the VMEM budget. TODO(synk): also tile d_in for extremely wide inputs.
    block_h, block_n = LANE, LANE
    for cand_h, cand_n in ((1024, 512), (512, 512), (512, 256), (256, 256),
                           (256, 128), (128, 128)):
        bh = min(cand_h, hid_p)
        bn = min(cand_n, d_out_p)
        if hid_p % bh or d_out_p % bn:
            continue
        if _tiled_footprint(block_b, d_in_p, bh, bn, out_itemsize) <= vmem_budget:
            block_h, block_n = bh, bn
            break

    grid = (b_p // block_b, d_out_p // block_n, hid_p // block_h)
    footprint = _tiled_footprint(block_b, d_in_p, block_h, block_n, out_itemsize)
    vmem_limit = min(vmem_budget, max(32 * 1024 * 1024, int(1.25 * footprint)))

    n_tiles = d_out_p // block_n
    cost = pl.CostEstimate(
        flops=2 * b_p * d_in_p * hid_p * n_tiles + 2 * b_p * hid_p * d_out_p,
        transcendentals=0,
        bytes_accessed=(x_p.size * 2 * n_tiles + p.w1.size * 2 * n_tiles
                        + p.w2.size * 2 * (b_p // block_b)
                        + b_p * d_out_p * out_itemsize),
    )

    return pl.pallas_call(
        _mlp2_tiled_kernel,
        out_shape=jax.ShapeDtypeStruct((b_p, d_out_p), out_dtype),
        grid_spec=pltpu.PrefetchScalarGridSpec(
            num_scalar_prefetch=0,
            grid=grid,
            in_specs=[
                pl.BlockSpec((block_b, d_in_p), lambda i, j, k: (i, 0)),   # x
                pl.BlockSpec((d_in_p, block_h), lambda i, j, k: (0, k)),   # W1
                pl.BlockSpec((1, block_h), lambda i, j, k: (0, k)),        # b1
                pl.BlockSpec((block_h, block_n), lambda i, j, k: (k, j)),  # W2
                pl.BlockSpec((1, block_n), lambda i, j, k: (0, j)),        # b2
            ],
            out_specs=pl.BlockSpec((block_b, block_n), lambda i, j, k: (i, j)),
            scratch_shapes=[pltpu.VMEM((block_b, block_n), jnp.float32)],
        ),
        compiler_params=pltpu.CompilerParams(
            dimension_semantics=("parallel", "parallel", "arbitrary"),
            vmem_limit_bytes=vmem_limit,
        ),
        cost_estimate=cost,
    )(x_p, p.w1, p.b1, p.w2, p.b2)


# ---------------------------------------------------------------------------
# Public API
# ---------------------------------------------------------------------------

def make_mlp2(w1, b1, w2, b2, *, block_b=None, path="auto",
              compute_dtype=jnp.bfloat16):
    """Build a jitted fused MLP2 forward: y = relu(x @ w1 + b1) @ w2 + b2.

    Parameters are padded / cast exactly once here. `path` is one of
    "auto" | "resident" | "tiled" | "xla".
    """
    assert path in ("auto", "resident", "tiled", "xla")
    p = prepare_mlp2_params(w1, b1, w2, b2, compute_dtype)
    d_in_p, hid_p = p.w1.shape
    d_out_p = p.w2.shape[1]
    vmem_budget = _vmem_budget_bytes()

    @jax.jit
    def forward(x):
        assert x.ndim == 2 and x.shape[1] == p.d_in, x.shape
        out_dtype = x.dtype
        B = x.shape[0]

        chosen = path
        if chosen == "auto":
            chosen = "xla" if B * p.d_in < _TINY_XLA_THRESHOLD else "resident"

        if chosen == "xla":
            # Tiny-problem fallback (same numerics: bf16 matmuls, f32 accum).
            xc = jnp.pad(x, ((0, 0), (0, d_in_p - p.d_in))).astype(compute_dtype)
            h = jnp.maximum(
                jnp.dot(xc, p.w1, preferred_element_type=jnp.float32) + p.b1, 0.0)
            out = jnp.dot(h.astype(compute_dtype), p.w2,
                          preferred_element_type=jnp.float32) + p.b2
            return out[:, : p.d_out].astype(out_dtype)

        out_itemsize = jnp.dtype(out_dtype).itemsize

        if block_b is None:
            bb = _pick_block_b(B, d_in_p, hid_p, d_out_p, out_itemsize, vmem_budget)
        else:
            bb = block_b
        assert bb % SUBLANE_BF16 == 0, \
            f"block_b must be a multiple of {SUBLANE_BF16}, got {bb}"

        if chosen == "resident":
            fits = (_resident_footprint(bb, d_in_p, hid_p, d_out_p, out_itemsize)
                    <= vmem_budget)
            if not fits and path == "auto":
                chosen = "tiled"     # weights too big to stay fully resident

        b_p = _round_up(B, bb)
        x_p = jnp.pad(x, ((0, b_p - B), (0, d_in_p - p.d_in))).astype(compute_dtype)

        if chosen == "resident":
            out_p = _mlp2_resident(x_p, p, bb, out_dtype, vmem_budget)
        else:
            out_p = _mlp2_tiled(x_p, p, bb, out_dtype, vmem_budget)

        return out_p[:B, : p.d_out]

    return forward


def init_mlp2_params(key, input_size, hidden_size, output_size, dtype=jnp.float32):
    """Deterministic init mimicking PyTorch Linear default (+-1/sqrt(fan_in))."""
    k1, k2, k3, k4 = jax.random.split(key, 4)
    lim1 = 1.0 / (input_size ** 0.5)
    lim2 = 1.0 / (hidden_size ** 0.5)
    w1 = jax.random.uniform(k1, (input_size, hidden_size), dtype, -lim1, lim1)
    b1 = jax.random.uniform(k2, (1, hidden_size), dtype, -lim1, lim1)
    w2 = jax.random.uniform(k3, (hidden_size, output_size), dtype, -lim2, lim2)
    b2 = jax.random.uniform(k4, (1, output_size), dtype, -lim2, lim2)
    return w1, b1, w2, b2


if __name__ == "__main__":
    key = jax.random.PRNGKey(0)
    kx, kp = jax.random.split(key)

    batch, input_size, hidden_size, output_size = 8, 32, 64, 16
    x = jax.random.normal(kx, (batch, input_size), jnp.float32)
    w1, b1, w2, b2 = init_mlp2_params(kp, input_size, hidden_size, output_size)

    # Pure-JAX f32 reference (same semantics as MLP2 with nn.ReLU).
    ref = jnp.maximum(x @ w1 + b1, 0.0) @ w2 + b2

    fwd_resident = make_mlp2(w1, b1, w2, b2, path="resident")  # Pallas, fused
    fwd_tiled = make_mlp2(w1, b1, w2, b2, path="tiled")        # Pallas, N/K-tiled
    fwd_auto = make_mlp2(w1, b1, w2, b2)                       # tiny -> XLA path

    results = {
        "resident": jax.block_until_ready(fwd_resident(x)),
        "tiled": jax.block_until_ready(fwd_tiled(x)),
        "auto": jax.block_until_ready(fwd_auto(x)),
    }

    for name, y in results.items():
        assert y.shape == (batch, output_size), (name, y.shape)
        err = float(jnp.max(jnp.abs(y - ref)))
        # bf16 MXU with f32 accumulation -> bf16-level tolerance.
        assert jnp.allclose(y, ref, atol=5e-2, rtol=5e-2), (name, err)

    print("KERNEL_OK")
</pallas_src>

<mosaic_0001>
module attributes {stable_mosaic.version = 11 : i64} {
  func.func @_mlp2_resident_kernel(%arg0: i32, %arg1: memref<16x128xbf16, #tpu.memory_space<vmem>>, %arg2: memref<128x128xbf16, #tpu.memory_space<vmem>>, %arg3: memref<1x128xf32, #tpu.memory_space<vmem>>, %arg4: memref<128x128xbf16, #tpu.memory_space<vmem>>, %arg5: memref<1x128xf32, #tpu.memory_space<vmem>>, %arg6: memref<16x128xf32, #tpu.memory_space<vmem>>) attributes {dimension_semantics = [#tpu.dimension_semantics<parallel>], iteration_bounds = array<i64: 1>, scalar_prefetch = 0 : i64, scratch_operands = 0 : i64, tpu.core_type = #tpu.core_type<tc>, window_params = [{transform_indices = @transform_0, window_bounds = array<i64: 16, 128>}, {pipeline_mode = #tpu.pipeline_mode<synchronous>, transform_indices = @transform_1, window_bounds = array<i64: 128, 128>}, {pipeline_mode = #tpu.pipeline_mode<synchronous>, transform_indices = @transform_2, window_bounds = array<i64: 1, 128>}, {pipeline_mode = #tpu.pipeline_mode<synchronous>, transform_indices = @transform_3, window_bounds = array<i64: 128, 128>}, {pipeline_mode = #tpu.pipeline_mode<synchronous>, transform_indices = @transform_4, window_bounds = array<i64: 1, 128>}, {transform_indices = @transform_5, window_bounds = array<i64: 16, 128>}]} {
    %c0 = arith.constant 0 : index
    %c0_0 = arith.constant 0 : index
    %0 = vector.load %arg1[%c0, %c0_0] : memref<16x128xbf16, #tpu.memory_space<vmem>>, vector<16x128xbf16>
    %c0_1 = arith.constant 0 : index
    %c0_2 = arith.constant 0 : index
    %1 = vector.load %arg2[%c0_1, %c0_2] : memref<128x128xbf16, #tpu.memory_space<vmem>>, vector<128x128xbf16>
    %cst = arith.constant dense<0.000000e+00> : vector<16x128xf32>
    %2 = tpu.matmul %0, %1, %cst {dimension_numbers = #tpu.dot_dimension_numbers<[1], [0], [0], [1], [0, 0, 1, 1], [], []>} : vector<16x128xbf16>, vector<128x128xbf16>, vector<16x128xf32> -> vector<16x128xf32>
    %c0_3 = arith.constant 0 : index
    %c0_4 = arith.constant 0 : index
    %3 = vector.load %arg3[%c0_3, %c0_4] : memref<1x128xf32, #tpu.memory_space<vmem>>, vector<1x128xf32>
    %4 = vector.broadcast %3 : vector<1x128xf32> to vector<16x128xf32>
    %5 = arith.addf %2, %4 : vector<16x128xf32>
    %cst_5 = arith.constant 0.000000e+00 : f32
    %6 = vector.broadcast %cst_5 : f32 to vector<16x128xf32>
    %7 = arith.maximumf %5, %6 : vector<16x128xf32>
    %8 = arith.truncf %7 : vector<16x128xf32> to vector<16x128xbf16>
    %c0_6 = arith.constant 0 : index
    %c0_7 = arith.constant 0 : index
    %9 = vector.load %arg4[%c0_6, %c0_7] : memref<128x128xbf16, #tpu.memory_space<vmem>>, vector<128x128xbf16>
    %cst_8 = arith.constant dense<0.000000e+00> : vector<16x128xf32>
    %10 = tpu.matmul %8, %9, %cst_8 {dimension_numbers = #tpu.dot_dimension_numbers<[1], [0], [0], [1], [0, 0, 1, 1], [], []>} : vector<16x128xbf16>, vector<128x128xbf16>, vector<16x128xf32> -> vector<16x128xf32>
    %c0_9 = arith.constant 0 : index
    %c0_10 = arith.constant 0 : index
    %11 = vector.load %arg5[%c0_9, %c0_10] : memref<1x128xf32, #tpu.memory_space<vmem>>, vector<1x128xf32>
    %12 = vector.broadcast %11 : vector<1x128xf32> to vector<16x128xf32>
    %13 = arith.addf %10, %12 : vector<16x128xf32>
    %c0_11 = arith.constant 0 : index
    %c0_12 = arith.constant 0 : index
    %14 = vector.load %arg6[%c0_11, %c0_12] : memref<16x128xf32, #tpu.memory_space<vmem>>, vector<16x128xf32>
    tpu.vector_store %arg6[%c0_11, %c0_12], %13 {strides = array<i32>} : memref<16x128xf32, #tpu.memory_space<vmem>>, vector<16x128xf32>,
    return
  }
  func.func @transform_0(%arg0: i32) -> (i32, i32) {
    %c0_i32 = arith.constant 0 : i32
    %c0_i32_0 = arith.constant 0 : i32
    return %arg0, %c0_i32 : i32, i32
  }
  func.func @transform_1(%arg0: i32) -> (i32, i32) {
    %c0_i32 = arith.constant 0 : i32
    %c0_i32_0 = arith.constant 0 : i32
    %c0_i32_1 = arith.constant 0 : i32
    return %c0_i32, %c0_i32_0 : i32, i32
  }
  func.func @transform_2(%arg0: i32) -> (i32, i32) {
    %c0_i32 = arith.constant 0 : i32
    %c0_i32_0 = arith.constant 0 : i32
    %c0_i32_1 = arith.constant 0 : i32
    return %c0_i32, %c0_i32_0 : i32, i32
  }
  func.func @transform_3(%arg0: i32) -> (i32, i32) {
    %c0_i32 = arith.constant 0 : i32
    %c0_i32_0 = arith.constant 0 : i32
    %c0_i32_1 = arith.constant 0 : i32
    return %c0_i32, %c0_i32_0 : i32, i32
  }
  func.func @transform_4(%arg0: i32) -> (i32, i32) {
    %c0_i32 = arith.constant 0 : i32
    %c0_i32_0 = arith.constant 0 : i32
    %c0_i32_1 = arith.constant 0 : i32
    return %c0_i32, %c0_i32_0 : i32, i32
  }
  func.func @transform_5(%arg0: i32) -> (i32, i32) {
    %c0_i32 = arith.constant 0 : i32
    %c0_i32_0 = arith.constant 0 : i32
    return %arg0, %c0_i32 : i32, i32
  }
}

</mosaic_0001>

<bundles_post_ra>
// kernel: forward.1
= control target key start
LH: loop header
LB: loop body
LE: loop exit
PB: predicated region body
PF: predicated region fallthrough
CT: control target
= control target key end

     0   :  { %10 = vsyncpa [#allocation3], 0  ;;  %s515_s0 = inlined_call_operand.vmem [shape: bf16[16,128], index: 0, kind: input, shape index: {}]   ;;  %s516_s1 = inlined_call_operand.hbm [shape: bf16[128,128], index: 1, kind: input, shape index: {}]   ;;  %s517_s2 = inlined_call_operand.vmem [shape: f32[1,128], index: 2, kind: input, shape index: {}]   ;;  %s518_s3 = inlined_call_operand.hbm [shape: bf16[128,128], index: 3, kind: input, shape index: {}]   ;;  %s519_s4 = inlined_call_operand.vmem [shape: f32[1,128], index: 4, kind: input, shape index: {}]   ;;  %s520_s5 = inlined_call_operand.vmem [shape: f32[16,128], index: 5, kind: output, shape index: {}]  }
   0x1   :  { %11 = vsyncpa [#allocation5], 0  ;;  %s440_s18 = smov [#allocation2]   ;;  %s392_s22 = scalar_lea.hbm %s516_s1, 1024 }
   0x2   :  { %s19_s19 = sshll.u32 %s440_s18, 4  ;;  %p393_p0 = scmp.ne.s32.totalorder %s516_s1, %s392_s22  ;;  %s20_s19 = int_to_ptr.vmem [resolvable:$true] %s19_s19 }
   0x3   :  { %p396_p1 = scmp.lt.u32.totalorder %s392_s22, %s516_s1 }
   0x5   :  { %p398_p2 = pnand %p396_p1, %p393_p0 }
   0x7   :  { %401 = shalt.err (!%p398_p2)
}
   0x8   :  { %s402_s27 = scalar_lea.vmem %s20_s19, 1024  ;;  %p407_p4 = scmp.lt.s32.totalorder %s20_s19, %s20_s19 }
   0x9   :  { %p403_p3 = scmp.ne.s32.totalorder %s20_s19, %s402_s27  ;;  %p408_p5 = scmp.lt.s32.totalorder %s402_s27, %s402_s27 }
   0xb   :  { %p409_p6 = por %p408_p5, %p407_p4 }
   0xd   :  { %p410_p7 = pnand %p409_p6, %p403_p3 }
   0xf   :  { %413 = shalt.err (!%p410_p7)
}
  0x10   :  { %s441_s28 = smov 64   ;;  %s442_s29 = smov 4  }
  0x11   :  { %25 = dma.hbm_to_vmem [thread:$0]  %s516_s1, 1024, %s20_s19, [#allocation3], %s441_s28, %s441_s28, %s442_s29  }
  0x12   :  { %s443_s7 = smov [#allocation4]   ;;  %s414_s11 = scalar_lea.hbm %s518_s3, 1024 }
  0x13   :  { %s33_s8 = sshll.u32 %s443_s7, 4  ;;  %p415_p8 = scmp.ne.s32.totalorder %s518_s3, %s414_s11  ;;  %s34_s8 = int_to_ptr.vmem [resolvable:$true] %s33_s8 }
  0x14   :  { %p418_p9 = scmp.lt.u32.totalorder %s414_s11, %s518_s3 }
  0x16   :  { %p420_p10 = pnand %p418_p9, %p415_p8 }
  0x18   :  { %423 = shalt.err (!%p420_p10)
}
  0x19   :  { %s424_s16 = scalar_lea.vmem %s34_s8, 1024  ;;  %p429_p12 = scmp.lt.s32.totalorder %s34_s8, %s34_s8 }
  0x1a   :  { %p425_p11 = scmp.ne.s32.totalorder %s34_s8, %s424_s16  ;;  %p430_p13 = scmp.lt.s32.totalorder %s424_s16, %s424_s16 }
  0x1c   :  { %p431_p0 = por %p430_p13, %p429_p12 }
  0x1e   :  { %p432_p1 = pnand %p431_p0, %p425_p11 }
  0x20   :  { %435 = shalt.err (!%p432_p1)
}
  0x21   :  { %39 = dma.hbm_to_vmem [thread:$0]  %s518_s3, 1024, %s34_s8, [#allocation5], %s441_s28, %s441_s28, %s442_s29  }
  0x22   :  { %436 = dma.done.wait [#allocation3], 1024  }
  0x23   :  { %437 = vsyncadd [#allocation3], 4294966272 }
  0x24   :  { %438 = dma.done.wait [#allocation5], 1024  }
  0x25   :  { %439 = vsyncadd [#allocation5], 4294966272  ;;  %v444_v0 = vmov 0.0   ;;  %vm445_vm0 = vmmov 0   ;;  %v375_v1 = vld [vmem:[#allocation2] sm:$0xff]   ;;  %v376_v2 = vld [vmem:[#allocation2 + $0x8] sm:$0xff]  }
  0x26   :  { %329 = vmatprep.subr.bf16.mxu0 %v444_v0  ;;  %345 = vmatprep.mubr.msk.bf16.mxu0 %vm445_vm0, %v444_v0  ;;  %v377_v3 = vld [vmem:[#allocation2 + $0x10] sm:$0xff]   ;;  %v384_v4 = vld [vmem:[#allocation4] sm:$0xff]   ;;  %v378_v5 = vld [vmem:[#allocation2 + $0x18] sm:$0xff]  }
  0x27   :  { %349 = vmatprep.subr.bf16.mxu1 %v444_v0  ;;  %365 = vmatprep.mubr.msk.bf16.mxu1 %vm445_vm0, %v444_v0  ;;  %v385_v6 = vld [vmem:[#allocation4 + $0x8] sm:$0xff]   ;;  %v379_v7 = vld [vmem:[#allocation2 + $0x20] sm:$0xff]   ;;  %v386_v8 = vld [vmem:[#allocation4 + $0x10] sm:$0xff]  }
  0x28   :  { %330 = vmatpush3.bf16.msra.mxu0 %v375_v1  ;;  %350 = vmatpush3.bf16.msra.mxu1 %v384_v4  ;;  %v380_v9 = vld [vmem:[#allocation2 + $0x28] sm:$0xff]   ;;  %v387_v10 = vld [vmem:[#allocation4 + $0x18] sm:$0xff]   ;;  %v381_v11 = vld [vmem:[#allocation2 + $0x30] sm:$0xff]  }
  0x29   :  { %331 = vmatprep.subr.bf16.mxu0 %v444_v0  ;;  %351 = vmatprep.subr.bf16.mxu1 %v444_v0  ;;  %v388_v12 = vld [vmem:[#allocation4 + $0x20] sm:$0xff]   ;;  %v382_v13 = vld [vmem:[#allocation2 + $0x38] sm:$0xff]   ;;  %v389_v14 = vld [vmem:[#allocation4 + $0x28] sm:$0xff]  }
  0x2a   :  { %v383_v15 = vld [vmem:[%s515_s0] sm:$0xff]   ;;  %v390_v16 = vld [vmem:[#allocation4 + $0x30] sm:$0xff]   ;;  %v391_v17 = vld [vmem:[#allocation4 + $0x38] sm:$0xff]  }
  0x2b   :  { %v292_v18 = vld [vmem:[%s517_s2] ss:$0 sm:$0xff] }
  0x2c   :  { %332 = vmatpush3.bf16.msra.mxu0 %v376_v2  ;;  %352 = vmatpush3.bf16.msra.mxu1 %v385_v6  ;;  %v302_v28 = vld [vmem:[%s519_s4] ss:$0 sm:$0xff] }
  0x2d   :  { %333 = vmatprep.subr.bf16.mxu0 %v444_v0  ;;  %353 = vmatprep.subr.bf16.mxu1 %v444_v0 }
  0x30   :  { %334 = vmatpush3.bf16.msra.mxu0 %v377_v3  ;;  %354 = vmatpush3.bf16.msra.mxu1 %v386_v8 }
  0x31   :  { %335 = vmatprep.subr.bf16.mxu0 %v444_v0  ;;  %355 = vmatprep.subr.bf16.mxu1 %v444_v0 }
  0x34   :  { %336 = vmatpush3.bf16.msra.mxu0 %v378_v5  ;;  %356 = vmatpush3.bf16.msra.mxu1 %v387_v10 }
  0x35   :  { %337 = vmatprep.subr.bf16.mxu0 %v444_v0  ;;  %357 = vmatprep.subr.bf16.mxu1 %v444_v0 }
  0x38   :  { %338 = vmatpush3.bf16.msra.mxu0 %v379_v7  ;;  %358 = vmatpush3.bf16.msra.mxu1 %v388_v12 }
  0x39   :  { %339 = vmatprep.subr.bf16.mxu0 %v444_v0  ;;  %359 = vmatprep.subr.bf16.mxu1 %v444_v0 }
  0x3c   :  { %340 = vmatpush3.bf16.msra.mxu0 %v380_v9  ;;  %360 = vmatpush3.bf16.msra.mxu1 %v389_v14 }
  0x3d   :  { %341 = vmatprep.subr.bf16.mxu0 %v444_v0  ;;  %361 = vmatprep.subr.bf16.mxu1 %v444_v0 }
  0x40   :  { %342 = vmatpush3.bf16.msra.mxu0 %v381_v11  ;;  %362 = vmatpush3.bf16.msra.mxu1 %v390_v16 }
  0x41   :  { %343 = vmatprep.subr.bf16.mxu0 %v444_v0  ;;  %363 = vmatprep.subr.bf16.mxu1 %v444_v0 }
  0x44   :  { %344 = vmatpush3.bf16.msra.mxu0 %v382_v13  ;;  %364 = vmatpush3.bf16.msra.mxu1 %v391_v17 }
  0x47   :  { %346 = vmatmul.mubr.bf16.vlgmr.msra.gmra.mrb[0].mxu0 %v383_v15 }
 0x11a   :  { %v162_v19 = vpop.f32.mrb[0].mxu0 }
 0x11b   :  { %v163_v20 = vadd.f32 %v292_v18, %v162_v19  ;;  %v347_v21 = vpop.f32.mrb[1].mxu0 }
 0x11c   :  { %v165_v22 = vpop.f32.mrb[2].mxu0 }
 0x11d   :  { %v166_v23 = vadd.f32 %v292_v18, %v165_v22  ;;  %v348_v24 = vpop.f32.mrb[3].mxu0  ;;  %v169_v25 = vmax.f32 %v163_v20, 0.0 }
 0x11f   :  { %v170_v26 = vmax.f32 %v166_v23, 0.0 }
 0x121   :  { %v171_v27 = vpack.c.bf16 %v170_v26, %v169_v25 }
 0x123   :  { %366 = vmatmul.mubr.bf16.vlgmr.msra.gmra.mrb[0].mxu1 %v171_v27 }
 0x1f6   :  { %v277_v29 = vpop.f32.mrb[0].mxu1 }
 0x1f7   :  { %v278_v30 = vadd.f32 %v302_v28, %v277_v29  ;;  %v367_v31 = vpop.f32.mrb[1].mxu1 }
 0x1f8   :  { %v280_v32 = vpop.f32.mrb[2].mxu1 }
 0x1f9   :  { %284 = vst [vmem:[%s520_s5] sm:$0xff] %v278_v30  ;;  %v281_v33 = vadd.f32 %v302_v28, %v280_v32  ;;  %v368_v34 = vpop.f32.mrb[3].mxu1 }
 0x1fb   :  { %285 = vst [vmem:[%s520_s5 + $0x8] sm:$0xff] %v281_v33 }
 0x1fc   :  { %290 = vsyncpa [#allocation3], 1 }
 0x1fd   :  { %291 = vsyncpa [#allocation5], 1 }

</bundles_post_ra>
